<compile_context>
chip_gen: v6e
topology: v6e:2x2x1
jax: 0.10.0
libtpu: 0.0.40
codegen_flags: <defaults>
</compile_context>

<pallas_src>
import functools

import jax
import jax.numpy as jnp
from jax.experimental import pallas as pl
from jax.experimental.pallas import tpu as pltpu

# Padded (lane-dense) dimensions used inside the kernel.
_KP = 128      # conv contraction dim: 9*Cin (=27) zero-padded to 128
_FP = 128      # backbone feature dim (=64) zero-padded to 128
_HP = 128      # head hidden dim (=128), already lane-dense
_NP = 128      # nb_classes (=5) padded to 128
_NEG_INF = -1e30


def _net_kernel(patches_ref, wc_ref, bc_ref, w1_ref, b1_ref, w2_ref, b2_ref,
                out_ref, acc_ref, *, inv_hw):
    """Grid = (batch [parallel], spatial-row tiles [arbitrary / reduction])."""
    t = pl.program_id(1)

    # ---- init the per-batch pooling accumulator on the first spatial tile ----
    @pl.when(t == 0)
    def _init():
        acc_ref[...] = jnp.zeros_like(acc_ref)

    # ---- backbone stem: conv-as-matmul (bf16 in, f32 acc) + SiLU ----
    conv = jnp.dot(patches_ref[0], wc_ref[...],
                   preferred_element_type=jnp.float32) + bc_ref[...]
    conv = conv * jax.nn.sigmoid(conv)                           # SiLU (f32)

    # ---- partial global-average-pool sum for this tile ----
    acc_ref[...] += jnp.sum(conv, axis=0, keepdims=True)         # (1, _FP)

    # ---- finalize on the last spatial tile: head + softmax ----
    @pl.when(t == pl.num_programs(1) - 1)
    def _finalize():
        feats = acc_ref[...] * inv_hw                            # (1, _FP) f32
        h = jnp.dot(feats.astype(jnp.bfloat16), w1_ref[...],
                    preferred_element_type=jnp.float32) + b1_ref[...]
        h = h * jax.nn.sigmoid(h)                                # SiLU
        # Dropout is identity in eval mode.
        logits = jnp.dot(h.astype(jnp.bfloat16), w2_ref[...],
                         preferred_element_type=jnp.float32) + b2_ref[...]
        # Softmax over classes; padded columns carry a -1e30 bias -> exp == 0.
        m = jnp.max(logits, axis=1, keepdims=True)
        e = jnp.exp(logits - m)
        probs = e * pl.reciprocal(jnp.sum(e, axis=1, keepdims=True),
                                  approx=True)
        # Lane-dense, unmasked store: broadcast the row over 8 sublanes.
        out_ref[...] = jnp.broadcast_to(probs, out_ref.shape)


def _pad_to(x, shape, fill=0.0):
    pads = [(0, t - s) for s, t in zip(x.shape, shape)]
    return jnp.pad(x, pads, constant_values=fill)


def _im2col_3x3(x_nhwc):
    """Unfold 3x3 patches (padding=1, stride=1). Returns (B, H*W, 9*C)."""
    b, h, w, c = x_nhwc.shape
    xp = jnp.pad(x_nhwc, ((0, 0), (1, 1), (1, 1), (0, 0)))
    cols = [xp[:, dy:dy + h, dx:dx + w, :]
            for dy in range(3) for dx in range(3)]
    patches = jnp.concatenate(cols, axis=-1)                     # (B, H, W, 9C)
    return patches.reshape(b, h * w, 9 * c)


def net_forward(x_nchw, params):
    """x_nchw: (B, 3, H, W) float32 -> softmax probs (B, nb_classes)."""
    wc, bc, w1, b1, w2, b2 = params
    b, cin, h, w = x_nchw.shape
    hw = h * w
    feat_dim = wc.shape[1]
    hidden = w1.shape[1]
    nb_classes = w2.shape[1]
    assert 9 * cin <= _KP and feat_dim <= _FP
    assert hidden == _HP and nb_classes <= _NP

    # --- glue: NCHW->NHWC, im2col, zero-pad to lane-dense shapes, bf16 cast ---
    x_nhwc = jnp.transpose(x_nchw, (0, 2, 3, 1))
    patches = _im2col_3x3(x_nhwc)                                # (B, HW, 9Cin)
    patches = _pad_to(patches, (b, hw, _KP)).astype(jnp.bfloat16)

    wc_p = _pad_to(wc, (_KP, _FP)).astype(jnp.bfloat16)
    bc_p = _pad_to(bc, (1, _FP)).astype(jnp.float32)
    w1_p = _pad_to(w1, (_FP, _HP)).astype(jnp.bfloat16)
    b1_p = b1.astype(jnp.float32)
    w2_p = _pad_to(w2, (_HP, _NP)).astype(jnp.bfloat16)
    b2_p = _pad_to(b2, (1, _NP), fill=_NEG_INF).astype(jnp.float32)

    # --- tiling: stream spatial rows; small, generation-safe VMEM footprint ---
    tile_m = 128 if hw % 128 == 0 else hw
    grid = (b, hw // tile_m)

    kernel = functools.partial(_net_kernel, inv_hw=1.0 / hw)

    cost = pl.CostEstimate(
        flops=int(2 * b * hw * _KP * _FP + 2 * b * (_FP * _HP + _HP * _NP)),
        transcendentals=int(b * hw * _FP + b * (_HP + 2 * _NP)),
        bytes_accessed=int(patches.size * 2
                           + (wc_p.size + w1_p.size + w2_p.size) * 2
                           + (bc_p.size + b1_p.size + b2_p.size) * 4
                           + b * 8 * _NP * 4))

    out = pl.pallas_call(
        kernel,
        out_shape=jax.ShapeDtypeStruct((b * 8, _NP), jnp.float32),
        grid_spec=pltpu.PrefetchScalarGridSpec(
            num_scalar_prefetch=0,
            grid=grid,
            in_specs=[
                # patch-row tiles stream per grid step (double-buffered)
                pl.BlockSpec((1, tile_m, _KP), lambda bi, ti: (bi, ti, 0)),
                # small weights / biases stay VMEM-resident (constant index)
                pl.BlockSpec((_KP, _FP), lambda bi, ti: (0, 0)),
                pl.BlockSpec((1, _FP), lambda bi, ti: (0, 0)),
                pl.BlockSpec((_FP, _HP), lambda bi, ti: (0, 0)),
                pl.BlockSpec((1, _HP), lambda bi, ti: (0, 0)),
                pl.BlockSpec((_HP, _NP), lambda bi, ti: (0, 0)),
                pl.BlockSpec((1, _NP), lambda bi, ti: (0, 0)),
            ],
            out_specs=pl.BlockSpec((8, _NP), lambda bi, ti: (bi, 0)),
            scratch_shapes=[pltpu.VMEM((1, _FP), jnp.float32)],
        ),
        compiler_params=pltpu.CompilerParams(
            dimension_semantics=("parallel", "arbitrary"),
            vmem_limit_bytes=32 * 1024 * 1024),
        cost_estimate=cost,
    )(patches, wc_p, bc_p, w1_p, b1_p, w2_p, b2_p)

    # Each batch's probs were broadcast over its 8-row lane-dense slab.
    return out.reshape(b, 8, _NP)[:, 0, :nb_classes]


def _reference_forward(x_nchw, params):
    """Pure-JAX f32 reference of the same synthetic stem + exact head."""
    wc, bc, w1, b1, w2, b2 = params
    x_nhwc = jnp.transpose(x_nchw, (0, 2, 3, 1))
    patches = _im2col_3x3(x_nhwc)                                # (B, HW, 27)
    conv = patches @ wc + bc
    conv = conv * jax.nn.sigmoid(conv)
    feats = jnp.mean(conv, axis=1)
    hdn = feats @ w1 + b1
    hdn = hdn * jax.nn.sigmoid(hdn)
    logits = hdn @ w2 + b2
    return jax.nn.softmax(logits, axis=1)


def init_params(key, cin=3, feat_dim=64, hidden=128, nb_classes=5):
    """Deterministic synthetic parameters (shapes implied by the module)."""
    ks = jax.random.split(key, 6)
    wc = jax.random.normal(ks[0], (9 * cin, feat_dim), jnp.float32) * 0.1
    bc = jax.random.normal(ks[1], (1, feat_dim), jnp.float32) * 0.01
    w1 = jax.random.normal(ks[2], (feat_dim, hidden), jnp.float32) * 0.1
    b1 = jax.random.normal(ks[3], (1, hidden), jnp.float32) * 0.01
    w2 = jax.random.normal(ks[4], (hidden, nb_classes), jnp.float32) * 0.1
    b2 = jax.random.normal(ks[5], (1, nb_classes), jnp.float32) * 0.01
    return (wc, bc, w1, b1, w2, b2)


if __name__ == "__main__":
    key = jax.random.PRNGKey(0)
    k_x, k_p = jax.random.split(key)

    B, C, H, W = 2, 3, 16, 16                                    # small NCHW
    x = jax.random.normal(k_x, (B, C, H, W), jnp.float32)
    params = init_params(k_p)

    probs = jax.block_until_ready(net_forward(x, params))
    ref = _reference_forward(x, params)

    assert probs.shape == (B, 5)
    assert bool(jnp.all(jnp.isfinite(probs)))
    # softmax rows sum to ~1 (approx reciprocal -> loose tolerance)
    assert bool(jnp.allclose(jnp.sum(probs, axis=1), 1.0, atol=1e-2))
    # matches f32 reference within bf16-matmul tolerance
    assert bool(jnp.allclose(probs, ref, atol=3e-2))
    print("KERNEL_OK")
</pallas_src>

<mosaic_0001>
module attributes {stable_mosaic.version = 11 : i64} {
  func.func @_net_kernel(%arg0: i32, %arg1: i32, %arg2: memref<1x128x128xbf16, #tpu.memory_space<vmem>>, %arg3: memref<128x128xbf16, #tpu.memory_space<vmem>>, %arg4: memref<1x128xf32, #tpu.memory_space<vmem>>, %arg5: memref<128x128xbf16, #tpu.memory_space<vmem>>, %arg6: memref<1x128xf32, #tpu.memory_space<vmem>>, %arg7: memref<128x128xbf16, #tpu.memory_space<vmem>>, %arg8: memref<1x128xf32, #tpu.memory_space<vmem>>, %arg9: memref<8x128xf32, #tpu.memory_space<vmem>>, %arg10: memref<1x128xf32, #tpu.memory_space<vmem>>) attributes {dimension_semantics = [#tpu.dimension_semantics<parallel>, #tpu.dimension_semantics<arbitrary>], iteration_bounds = array<i64: 2, 2>, scalar_prefetch = 0 : i64, scratch_operands = 1 : i64, tpu.core_type = #tpu.core_type<tc>, window_params = [{transform_indices = @transform_0, window_bounds = array<i64: 1, 128, 128>}, {pipeline_mode = #tpu.pipeline_mode<synchronous>, transform_indices = @transform_1, window_bounds = array<i64: 128, 128>}, {pipeline_mode = #tpu.pipeline_mode<synchronous>, transform_indices = @transform_2, window_bounds = array<i64: 1, 128>}, {pipeline_mode = #tpu.pipeline_mode<synchronous>, transform_indices = @transform_3, window_bounds = array<i64: 128, 128>}, {pipeline_mode = #tpu.pipeline_mode<synchronous>, transform_indices = @transform_4, window_bounds = array<i64: 1, 128>}, {pipeline_mode = #tpu.pipeline_mode<synchronous>, transform_indices = @transform_5, window_bounds = array<i64: 128, 128>}, {pipeline_mode = #tpu.pipeline_mode<synchronous>, transform_indices = @transform_6, window_bounds = array<i64: 1, 128>}, {transform_indices = @transform_7, window_bounds = array<i64: 8, 128>}]} {
    %c0_i32 = arith.constant 0 : i32
    %0 = arith.cmpi eq, %arg1, %c0_i32 : i32
    %1 = arith.extui %0 : i1 to i32
    %c0_i32_0 = arith.constant 0 : i32
    %2 = arith.cmpi ne, %1, %c0_i32_0 : i32
    scf.if %2 {
      %cst_14 = arith.constant 0.000000e+00 : f32
      %24 = vector.broadcast %cst_14 : f32 to vector<1x128xf32>
      %c0_15 = arith.constant 0 : index
      %c0_16 = arith.constant 0 : index
      %25 = vector.load %arg10[%c0_15, %c0_16] : memref<1x128xf32, #tpu.memory_space<vmem>>, vector<1x128xf32>
      tpu.vector_store %arg10[%c0_15, %c0_16], %24 {strides = array<i32>} : memref<1x128xf32, #tpu.memory_space<vmem>>, vector<1x128xf32>,
    } else {
    }
    %c0 = arith.constant 0 : index
    %c0_1 = arith.constant 0 : index
    %c0_2 = arith.constant 0 : index
    %3 = vector.load %arg2[%c0, %c0_1, %c0_2] : memref<1x128x128xbf16, #tpu.memory_space<vmem>>, vector<1x128x128xbf16>
    %4 = vector.shape_cast %3 : vector<1x128x128xbf16> to vector<128x128xbf16>
    %c0_3 = arith.constant 0 : index
    %c0_4 = arith.constant 0 : index
    %5 = vector.load %arg3[%c0_3, %c0_4] : memref<128x128xbf16, #tpu.memory_space<vmem>>, vector<128x128xbf16>
    %cst = arith.constant dense<0.000000e+00> : vector<128x128xf32>
    %6 = tpu.matmul %4, %5, %cst {dimension_numbers = #tpu.dot_dimension_numbers<[1], [0], [0], [1], [0, 0, 1, 1], [], []>} : vector<128x128xbf16>, vector<128x128xbf16>, vector<128x128xf32> -> vector<128x128xf32>
    %c0_5 = arith.constant 0 : index
    %c0_6 = arith.constant 0 : index
    %7 = vector.load %arg4[%c0_5, %c0_6] : memref<1x128xf32, #tpu.memory_space<vmem>>, vector<1x128xf32>
    %8 = vector.broadcast %7 : vector<1x128xf32> to vector<128x128xf32>
    %9 = arith.addf %6, %8 : vector<128x128xf32>
    %10 = arith.negf %9 : vector<128x128xf32>
    %11 = math.exp %10 : vector<128x128xf32>
    %cst_7 = arith.constant 1.000000e+00 : f32
    %12 = vector.broadcast %cst_7 : f32 to vector<128x128xf32>
    %13 = arith.addf %12, %11 : vector<128x128xf32>
    %14 = arith.divf %12, %13 : vector<128x128xf32>
    %15 = arith.mulf %9, %14 : vector<128x128xf32>
    %c0_8 = arith.constant 0 : index
    %c0_9 = arith.constant 0 : index
    %16 = vector.load %arg10[%c0_8, %c0_9] : memref<1x128xf32, #tpu.memory_space<vmem>>, vector<1x128xf32>
    %cst_10 = arith.constant dense<0.000000e+00> : vector<128xf32>
    %17 = vector.multi_reduction <add>, %15, %cst_10 [0] : vector<128x128xf32> to vector<128xf32>
    %18 = vector.shape_cast %17 : vector<128xf32> to vector<1x128xf32>
    %19 = arith.addf %16, %18 : vector<1x128xf32>
    %c0_11 = arith.constant 0 : index
    %c0_12 = arith.constant 0 : index
    %20 = vector.load %arg10[%c0_11, %c0_12] : memref<1x128xf32, #tpu.memory_space<vmem>>, vector<1x128xf32>
    tpu.vector_store %arg10[%c0_11, %c0_12], %19 {strides = array<i32>} : memref<1x128xf32, #tpu.memory_space<vmem>>, vector<1x128xf32>,
    %c1_i32 = arith.constant 1 : i32
    %21 = arith.cmpi eq, %arg1, %c1_i32 : i32
    %22 = arith.extui %21 : i1 to i32
    %c0_i32_13 = arith.constant 0 : i32
    %23 = arith.cmpi ne, %22, %c0_i32_13 : i32
    scf.if %23 {
      %c0_14 = arith.constant 0 : index
      %c0_15 = arith.constant 0 : index
      %24 = vector.load %arg10[%c0_14, %c0_15] : memref<1x128xf32, #tpu.memory_space<vmem>>, vector<1x128xf32>
      %cst_16 = arith.constant 3.906250e-03 : f32
      %25 = vector.broadcast %cst_16 : f32 to vector<1x128xf32>
      %26 = arith.mulf %24, %25 : vector<1x128xf32>
      %27 = arith.truncf %26 : vector<1x128xf32> to vector<1x128xbf16>
      %c0_17 = arith.constant 0 : index
      %c0_18 = arith.constant 0 : index
      %28 = vector.load %arg5[%c0_17, %c0_18] : memref<128x128xbf16, #tpu.memory_space<vmem>>, vector<128x128xbf16>
      %cst_19 = arith.constant dense<0.000000e+00> : vector<1x128xf32>
      %29 = tpu.matmul %27, %28, %cst_19 {dimension_numbers = #tpu.dot_dimension_numbers<[1], [0], [0], [1], [0, 0, 1, 1], [], []>} : vector<1x128xbf16>, vector<128x128xbf16>, vector<1x128xf32> -> vector<1x128xf32>
      %c0_20 = arith.constant 0 : index
      %c0_21 = arith.constant 0 : index
      %30 = vector.load %arg6[%c0_20, %c0_21] : memref<1x128xf32, #tpu.memory_space<vmem>>, vector<1x128xf32>
      %31 = arith.addf %29, %30 : vector<1x128xf32>
      %32 = arith.negf %31 : vector<1x128xf32>
      %33 = math.exp %32 : vector<1x128xf32>
      %cst_22 = arith.constant 1.000000e+00 : f32
      %34 = vector.broadcast %cst_22 : f32 to vector<1x128xf32>
      %35 = arith.addf %34, %33 : vector<1x128xf32>
      %36 = arith.divf %34, %35 : vector<1x128xf32>
      %37 = arith.mulf %31, %36 : vector<1x128xf32>
      %38 = arith.truncf %37 : vector<1x128xf32> to vector<1x128xbf16>
      %c0_23 = arith.constant 0 : index
      %c0_24 = arith.constant 0 : index
      %39 = vector.load %arg7[%c0_23, %c0_24] : memref<128x128xbf16, #tpu.memory_space<vmem>>, vector<128x128xbf16>
      %cst_25 = arith.constant dense<0.000000e+00> : vector<1x128xf32>
      %40 = tpu.matmul %38, %39, %cst_25 {dimension_numbers = #tpu.dot_dimension_numbers<[1], [0], [0], [1], [0, 0, 1, 1], [], []>} : vector<1x128xbf16>, vector<128x128xbf16>, vector<1x128xf32> -> vector<1x128xf32>
      %c0_26 = arith.constant 0 : index
      %c0_27 = arith.constant 0 : index
      %41 = vector.load %arg8[%c0_26, %c0_27] : memref<1x128xf32, #tpu.memory_space<vmem>>, vector<1x128xf32>
      %42 = arith.addf %40, %41 : vector<1x128xf32>
      %cst_28 = arith.constant dense<0xFF800000> : vector<1xf32>
      %43 = vector.multi_reduction <maximumf>, %42, %cst_28 [1] : vector<1x128xf32> to vector<1xf32>
      %44 = vector.shape_cast %43 : vector<1xf32> to vector<1x1xf32>
      %45 = vector.broadcast %44 : vector<1x1xf32> to vector<1x128xf32>
      %46 = arith.subf %42, %45 : vector<1x128xf32>
      %47 = math.exp %46 : vector<1x128xf32>
      %cst_29 = arith.constant dense<0.000000e+00> : vector<1xf32>
      %48 = vector.multi_reduction <add>, %47, %cst_29 [1] : vector<1x128xf32> to vector<1xf32>
      %49 = vector.shape_cast %48 : vector<1xf32> to vector<1x1xf32>
      %50 = tpu.reciprocal %49 {approx = true} : vector<1x1xf32> -> vector<1x1xf32>
      %51 = vector.broadcast %50 : vector<1x1xf32> to vector<1x128xf32>
      %52 = arith.mulf %47, %51 : vector<1x128xf32>
      %53 = vector.shape_cast %52 : vector<1x128xf32> to vector<1x128xf32>
      %54 = vector.broadcast %53 : vector<1x128xf32> to vector<8x128xf32>
      %c0_30 = arith.constant 0 : index
      %c0_31 = arith.constant 0 : index
      %55 = vector.load %arg9[%c0_30, %c0_31] : memref<8x128xf32, #tpu.memory_space<vmem>>, vector<8x128xf32>
      tpu.vector_store %arg9[%c0_30, %c0_31], %54 {strides = array<i32>} : memref<8x128xf32, #tpu.memory_space<vmem>>, vector<8x128xf32>,
    } else {
    }
    return
  }
  func.func @transform_0(%arg0: i32, %arg1: i32) -> (i32, i32, i32) {
    %c0_i32 = arith.constant 0 : i32
    %c0_i32_0 = arith.constant 0 : i32
    return %arg0, %arg1, %c0_i32 : i32, i32, i32
  }
  func.func @transform_1(%arg0: i32, %arg1: i32) -> (i32, i32) {
    %c0_i32 = arith.constant 0 : i32
    %c0_i32_0 = arith.constant 0 : i32
    %c0_i32_1 = arith.constant 0 : i32
    return %c0_i32, %c0_i32_0 : i32, i32
  }
  func.func @transform_2(%arg0: i32, %arg1: i32) -> (i32, i32) {
    %c0_i32 = arith.constant 0 : i32
    %c0_i32_0 = arith.constant 0 : i32
    %c0_i32_1 = arith.constant 0 : i32
    return %c0_i32, %c0_i32_0 : i32, i32
  }
  func.func @transform_3(%arg0: i32, %arg1: i32) -> (i32, i32) {
    %c0_i32 = arith.constant 0 : i32
    %c0_i32_0 = arith.constant 0 : i32
    %c0_i32_1 = arith.constant 0 : i32
    return %c0_i32, %c0_i32_0 : i32, i32
  }
  func.func @transform_4(%arg0: i32, %arg1: i32) -> (i32, i32) {
    %c0_i32 = arith.constant 0 : i32
    %c0_i32_0 = arith.constant 0 : i32
    %c0_i32_1 = arith.constant 0 : i32
    return %c0_i32, %c0_i32_0 : i32, i32
  }
  func.func @transform_5(%arg0: i32, %arg1: i32) -> (i32, i32) {
    %c0_i32 = arith.constant 0 : i32
    %c0_i32_0 = arith.constant 0 : i32
    %c0_i32_1 = arith.constant 0 : i32
    return %c0_i32, %c0_i32_0 : i32, i32
  }
  func.func @transform_6(%arg0: i32, %arg1: i32) -> (i32, i32) {
    %c0_i32 = arith.constant 0 : i32
    %c0_i32_0 = arith.constant 0 : i32
    %c0_i32_1 = arith.constant 0 : i32
    return %c0_i32, %c0_i32_0 : i32, i32
  }
  func.func @transform_7(%arg0: i32, %arg1: i32) -> (i32, i32) {
    %c0_i32 = arith.constant 0 : i32
    %c0_i32_0 = arith.constant 0 : i32
    return %arg0, %c0_i32 : i32, i32
  }
}

</mosaic_0001>

<bundles_post_ra>
// kernel: tpu_custom_call.1
= control target key start
LH: loop header
LB: loop body
LE: loop exit
PB: predicated region body
PF: predicated region fallthrough
CT: control target
= control target key end

     0   :  { %s2184_s0 = inlined_call_operand.hbm [shape: bf16[2,256,128], index: 0, kind: input, shape index: {}]   ;;  %s2185_s1 = inlined_call_operand.hbm [shape: bf16[128,128], index: 1, kind: input, shape index: {}]   ;;  %s2186_s2 = inlined_call_operand.vmem [shape: f32[1,128], index: 2, kind: input, shape index: {}]   ;;  %s2187_s3 = inlined_call_operand.hbm [shape: bf16[128,128], index: 3, kind: input, shape index: {}]   ;;  %s2188_s4 = inlined_call_operand.vmem [shape: f32[1,128], index: 4, kind: input, shape index: {}]   ;;  %s2189_s5 = inlined_call_operand.hbm [shape: bf16[128,128], index: 5, kind: input, shape index: {}]   ;;  %s2190_s6 = inlined_call_operand.vmem [shape: f32[1,128], index: 6, kind: input, shape index: {}]   ;;  %s2191_s7 = inlined_call_operand.hbm [shape: f32[16,128], index: 7, kind: output, shape index: {}]  }
   0x1   :  { %2200 = sst [smem:[#allocation21_spill]] %s2185_s1 }
   0x2   :  { %2201 = sst [smem:[#allocation22_spill]] %s2187_s3 }
   0x3   :  { %2202 = sst [smem:[#allocation23_spill]] %s2188_s4 }
   0x4   :  { %2203 = sst [smem:[#allocation24_spill]] %s2189_s5 }
   0x5   :  { %2204 = sst [smem:[#allocation25_spill]] %s2190_s6 }
   0x6   :  { %2205 = sst [smem:[#allocation26_spill]] %s2191_s7 }
   0x7   :  { %12 = vsyncpa [#allocation4], 0 }
   0x8   :  { %14 = vsyncpa [#allocation4 + $0x1], 0 }
   0x9   :  { %15 = vsyncpa [#allocation7], 0 }
   0xa   :  { %16 = vsyncpa [#allocation10], 0 }
   0xb   :  { %17 = vsyncpa [#allocation5], 0 }
   0xc   :  { %19 = vsyncpa [#allocation5 + $0x1], 0  ;;  %s1824_s24 = smov 0   ;;  %s1826_s25 = smov 0  }
   0xd   :  { %s1828_s26 = smov 0   ;;  %s1830_s27 = smov 0  }
   0xe   :  { %s1832_s28 = smov 0   ;;  %s1834_s29 = smov 0  }
   0xf   :  { %s1836_s30 = smov 0   ;;  %s1838_s8 = smov 0  }
  0x10   :  { %s1840_s9 = smov 0   ;;  %s1842_s10 = smov 0  }
  0x11   :  { %s1844_s11 = smov 0  }
  0x12 LB: > { %2206 = sst [smem:[#allocation16_spill]] %s1732_s24  ;;  %s1101_s12 = sadd.s32 4294967295, %s1772_s11   ;;  %s1772_s11 = sphi %s1844_s11, %s25_s11   ;;  %s1768_s10 = sphi %s1842_s10, %s2243_s10   ;;  %s1764_s9 = sphi %s1840_s9, %s2242_s9   ;;  %s1760_s8 = sphi %s1838_s8, %s2241_s8   ;;  %s1756_s30 = sphi %s1836_s30, %s2240_s30   ;;  %s1752_s29 = sphi %s1834_s29, %s2239_s29   ;;  %s1748_s28 = sphi %s1832_s28, %s2238_s28   ;;  %s1744_s27 = sphi %s1830_s27, %s2237_s27   ;;  %s1740_s26 = sphi %s1828_s26, %s2236_s26   ;;  %s1736_s25 = sphi %s1826_s25, %s2235_s25   ;;  %s1732_s24 = sphi %s1824_s24, %s2234_s24  }
  0x13   : > { %2207 = sst [smem:[#allocation17_spill]] %s1760_s8  ;;  %s1102_s13 = sadd.s32 4294967294, %s1772_s11  }
  0x14   : > { %p59_p0 = scmp.ne.s32.totalorder %s1748_s28, %s1744_s27  ;;  %p1880_p1 = scmp.eq.s32.totalorder %s1101_s12, 0 }
  0x15   : > { %p208_p2 = scmp.ne.s32.totalorder %s1740_s26, %s1736_s25  ;;  %p209_p4 = scmp.eq.s32.totalorder %s1101_s12, 3 }
  0x16   : > { %p1889_p3 = por %p1880_p1, %p59_p0  ;;  %p214_p5 = scmp.ne.s32.totalorder %s1736_s25, %s1732_s24 }
  0x17   : > { %p215_p6 = scmp.eq.s32.totalorder %s1102_s13, 3  ;;  %p1895_p7 = por %p209_p4, %p208_p2 }
  0x18   : > { %p1103_p8 = scmp.ge.s32.totalorder %s1772_s11, 1  ;;  %p222_p10 = scmp.lt.s32.totalorder %s1772_s11, 5 }
  0x19   : > { %s2210_s17 = scalar_select %p1895_p7, 1, 0 }
  0x1a   : > { %p1900_p9 = por %p215_p6, %p214_p5  ;;  %p1905_p11 = pnand %p1103_p8, %p222_p10 }
  0x1b   : > { %2211 = sst [smem:[#allocation18_spill]] %s2210_s17  ;;  %s1774_s20 = smov [#allocation6]  }
  0x1c   : > { %s2212_s18 = scalar_select %p1900_p9, 1, 0 }
  0x1d   : > { %s234_s21 = sshll.u32 %s1774_s20, 4  ;;  %p1312_p12 = pneg %p1905_p11  ;;  %s235_s21 = int_to_ptr.vmem [resolvable:$true] %s234_s21 }
  0x1e   : > { %2213 = sst [smem:[#allocation19_spill]] %s2212_s18  ;;  %s1775_s23 = smov [#allocation8]  }
  0x1f   : > { %p1913_p13 = pnand %p1312_p12, %p1880_p1  ;;  %s250_s27 = sshll.u32 %s1775_s23, 4  ;;  %s251_s27 = int_to_ptr.vmem [resolvable:$true] %s250_s27 }
  0x20   : > { %s1776_s12 = smov [#allocation9]   ;;  %s1549_s15 = scalar_lea.vmem %s235_s21, 1024 }
  0x21   : > { %s266_s13 = sshll.u32 %s1776_s12, 4  ;;  %p1540_p0 = pneg %p1913_p13  ;;  %s267_s13 = int_to_ptr.vmem [resolvable:$true] %s266_s13 }
  0x22   : > { %p1550_p2 = scmp.ne.s32.totalorder %s235_s21, %s1549_s15  ;;  %p1557_p6 = scmp.lt.s32.totalorder %s235_s21, %s235_s21 }
  0x23   : > { %p1558_p8 = scmp.lt.s32.totalorder %s1549_s15, %s1549_s15 }
  0x24   : > { %p1552_p4 = pnand %p1550_p2, %p1540_p0 }
  0x25   : > { %p1559_p10 = por %p1558_p8, %p1557_p6 }
  0x26   : > { %p1553_p5 = pneg %p1552_p4 }
  0x28   : > { %p1560_p12 = pnand %p1559_p10, %p1553_p5 }
  0x2a   : > { %1563 = shalt.err (!%p1560_p12)
}
  0x2b   : > { %s2195_s20 = smov 64   ;;  %s2196_s23 = smov 4  }
  0x2c   : > { %s2216_s1 = sld [smem:[#allocation21_spill]]  ;;  %s1575_s24 = scalar_lea.vmem %s251_s27, 1024 }
  0x2d   : > { %p1576_p2 = scmp.ne.s32.totalorder %s251_s27, %s1575_s24  ;;  %p1583_p5 = scmp.lt.s32.totalorder %s251_s27, %s251_s27 }
  0x2e   : > { %p1584_p8 = scmp.lt.s32.totalorder %s1575_s24, %s1575_s24 }
  0x2f   : > { %p1578_p4 = pnand %p1576_p2, %p1540_p0 }
  0x30   : > { %p1585_p10 = por %p1584_p8, %p1583_p5 }
  0x31   : > { %p1579_p6 = pneg %p1578_p4 }
  0x32   : > { %1315 = dma.hbm_to_vmem [thread:$0]  (!%p1913_p13), %s2216_s1, 1024, %s235_s21, [#allocation7], %s2195_s20, %s2195_s20, %s2196_s23  }
  0x33   : > { %p1586_p12 = pnand %p1585_p10, %p1579_p6 }
  0x35   : > { %1589 = shalt.err (!%p1586_p12)
}
  0x36   : > { %s2217_s3 = sld [smem:[#allocation22_spill]]  ;;  %s1601_s18 = scalar_lea.vmem %s267_s13, 1024 }
  0x37   : > { %p1602_p9 = scmp.ne.s32.totalorder %s267_s13, %s1601_s18  ;;  %p1609_p5 = scmp.lt.s32.totalorder %s267_s13, %s267_s13 }
  0x38   : > { %p1610_p6 = scmp.lt.s32.totalorder %s1601_s18, %s1601_s18 }
  0x39   : > { %p1604_p2 = pnand %p1602_p9, %p1540_p0 }
  0x3a   : > { %p1611_p8 = por %p1610_p6, %p1609_p5 }
  0x3b   : > { %p1605_p4 = pneg %p1604_p2 }
  0x3c   : > { %1318 = dma.hbm_to_vmem [thread:$0]  (!%p1913_p13), %s2217_s3, 1024, %s251_s27, [#allocation7], %s2195_s20, %s2195_s20, %s2196_s23  }
  0x3d   : > { %p1612_p10 = pnand %p1611_p8, %p1605_p4 }
  0x3f   : > { %1615 = shalt.err (!%p1612_p10)
}
  0x40   : > { %s2218_s5 = sld [smem:[#allocation24_spill]]  ;;  %s34_s21 = sadd.s32 1, %s1764_s9 }
  0x41   : > { %p35_p9 = scmp.ge.s32.totalorder %s34_s21, 2  ;;  %s37_s22 = sadd.s32 1, %s1768_s10 }
  0x42   : > { %s46_s27 = sadd.s32 1, %s1752_s29  ;;  %p53_p0 = scmp.ne.s32.totalorder %s1752_s29, %s1748_s28 }
  0x43   : > { %s2245_s21 = smov (%p35_p9, %s34_s21), 0  ;;  %s2247_s22 = smov (!%p35_p9, %s37_s22), %s1768_s10 }
  0x44   : > { %2219 = sst [smem:[#allocation20_spill]] %s2245_s21  ;;  %s42_s12 = ssub.s32 %s1764_s9, %s2245_s21 }
  0x45   : > { %p54_p12 = scmp.eq.s32.totalorder %s1772_s11, 0  ;;  %p39_p2 = scmp.ge.s32.totalorder %s2247_s22, 2 }
  0x46   : > { %1321 = dma.hbm_to_vmem [thread:$0]  (!%p1913_p13), %s2218_s5, 1024, %s267_s13, [#allocation10], %s2195_s20, %s2195_s20, %s2196_s23  }
  0x47   : > { %p1333_p4 = scmp.lt.s32.totalorder %s1772_s11, 4  ;;  %p1964_p13 = por %p54_p12, %p53_p0 }
  0x48   : > { %s283_s15 = sand.u32 1, %s1752_s29   ;;  %s2249_s22 = smov (%p39_p2, %s2247_s22), 0 }
  0x49   : > { %s1108_s18 = sshll.u32 %s283_s15, 6  ;;  %s41_s7 = ssub.s32 %s1768_s10, %s2249_s22 }
  0x4a   : > { %s43_s24 = sor.u32 %s42_s12, %s41_s7  ;;  %p196_p5 = scmp.eq.s32.totalorder %s41_s7, 0 }
  0x4b   : > { %p44_p6 = scmp.eq.s32.totalorder %s43_s24, 0  ;;  %s1109_s20 = sshll.u32 %s1764_s9, 4 }
  0x4c   : > { %s2221_s23 = sadd.s32 1, %s1740_s26  ;;  %s1110_s5 = sshll.u32 %s1768_s10, 5 }
  0x4d   : > { %s1977_s1 = scalar_select %p196_p5, %s1740_s26, %s2221_s23  }
  0x4e   : > { %s1980_s3 = scalar_select %p44_p6, %s1752_s29, %s46_s27  }
  0x4f   : > { %s287_s21 = scalar_lea.vmem [#allocation3], %s1108_s18  ;;  %s293_s8 = sadd.s32 %s1110_s5, %s1109_s20 }
  0x50   : > { %s296_s17 = sshll.u32 %s287_s21, 4  ;;  %s1111_s6 = sshll.u32 %s293_s8, 6  ;;  %s297_s17 = int_to_ptr.vmem [resolvable:$true] %s296_s17 }
  0x51   : > { %p1987_p8 = pnand %p1333_p4, %p1964_p13  ;;  %s295_s23 = scalar_lea.hbm %s2184_s0, %s1111_s6 }
  0x52   : > { %s284_s24 = scalar_lea.sflag [#allocation4], %s283_s15  ;;  %s1629_s27 = scalar_lea.vmem %s297_s17, 1024 }
  0x53   : > { %p1618_p10 = pneg %p1987_p8  ;;  %p1630_p9 = scmp.ne.s32.totalorder %s297_s17, %s1629_s27 }
  0x54   : > { %s1779_s5 = smov [#allocation3]  }
  0x55   : > { %p1632_p0 = pnand %p1630_p9, %p1618_p10  ;;  %s1634_s8 = sshll.u32 %s1779_s5, 4  ;;  %s1635_s8 = int_to_ptr.vmem [resolvable:$false] %s1634_s8 }
  0x56   : > { %s1636_s20 = scalar_lea.vmem %s1635_s8, 2048  ;;  %p1637_p2 = scmp.lt.s32.totalorder %s297_s17, %s1635_s8 }
  0x57   : > { %p1633_p12 = pneg %p1632_p0  ;;  %p1638_p4 = scmp.lt.s32.totalorder %s1636_s20, %s1629_s27 }
  0x59   : > { %p1639_p13 = por %p1638_p4, %p1637_p2 }
  0x5b   : > { %p1640_p5 = pnand %p1639_p13, %p1633_p12 }
  0x5d   : > { %1643 = shalt.err (!%p1640_p5)
}
  0x5e   : > { %s2223_s21 = smov 4   ;;  %s2224_s6 = smov 64  }
  0x5f   : > { %1325 = dma.hbm_to_vmem [thread:$0]  (!%p1987_p8), %s295_s23, 1024, %s297_s17, %s284_s24, %s2224_s6, %s2224_s6, %s2223_s21  }
  0x60   : > { %308 = sbr.rel (%p1905_p11) target bundleno = 1226 (0x4ca), region = 48  ;;  %s310_s13 = sand.u32 (!%p1905_p11), 1, %s1748_s28  }
  0x61   : > { %s1113_s15 = sshll.u32 (!%p1905_p11), %s310_s13, 6  ;;  %s311_s18 = scalar_lea.sflag (!%p1905_p11), [#allocation4], %s310_s13 }
  0x62   : > { %s2004_s12 = scalar_lea.vmem (!%p1905_p11), [#allocation3], %s1113_s15 }
  0x65   : > { %1715 = dma.done.wait (%p1889_p3), %s311_s18, 1024  }
  0x66   : > { %1717 = vsyncadd (%p1889_p3), %s311_s18, 4294966272 }
  0x67   : > { %1719 = dma.done.wait (%p1880_p1), [#allocation7], 2048  }
  0x68   : > { %1721 = vsyncadd (%p1880_p1), [#allocation7], 4294965248 }
  0x69   : > { %1723 = dma.done.wait (%p1880_p1), [#allocation10], 1024  }
  0x6a   : > { %1725 = vsyncadd (%p1880_p1), [#allocation10], 4294966272  ;;  %s354_s4 = sand.u32 1, %s1736_s25   ;;  %p1118_p3 = scmp.ne.s32.totalorder %s1756_s30, 0 }
  0x6b   : > { %s2021_s17 = sshll.u32 %s354_s4, 3 }
  0x6c   : > { %s356_s16 = scalar_lea.vmem [#allocation11], %s2021_s17  ;;  %362 = sbr.rel (%p1118_p3) target bundleno = 115 (0x73), region = 68 }
  0x71   : > { %v1780_v0 = vmov 0.0  }
  0x72   : > { %363 = vst [vmem:[#allocation2] sm:$0x1] %v1780_v0 }
  0x73 PF: > { %v1434_v1 = vld [vmem:[#allocation6 + $0x38] sm:$0xff]   ;;  %v1435_v2 = vld [vmem:[#allocation6 + $0x30] sm:$0xff]   ;;  %v1436_v3 = vld [vmem:[#allocation6 + $0x28] sm:$0xff]   ;;  %p1152_p1 = scmp.ne.s32.totalorder %s1756_s30, 1 }
  0x74   : > { %1208 = vmatprep.subr.bf16.mxu0 %v1434_v1  ;;  %1280 = vmatprep.subr.bf16.mxu1 %v1434_v1  ;;  %v1437_v4 = vld [vmem:[#allocation6 + $0x20] sm:$0xff]   ;;  %v1438_v7 = vld [vmem:[#allocation6 + $0x18] sm:$0xff]   ;;  %v1439_v8 = vld [vmem:[#allocation6 + $0x10] sm:$0xff]   ;;  %s2225_s23 = sld [smem:[#allocation23_spill]] (!%p1152_p1) }
  0x75   : > { %1209 = vmatpush3.bf16.msra.mxu0 %v1434_v1  ;;  %1288 = vmatpush3.bf16.msra.mxu1 %v1434_v1  ;;  %v1442_v5 = vld [vmem:[%s2004_s12] sm:$0xff]   ;;  %v1440_v9 = vld [vmem:[#allocation6 + $0x8] sm:$0xff]   ;;  %v1446_v13 = vld [vmem:[%s2004_s12 + $0x10] sm:$0xff]   ;;  %s2226_s5 = sld [smem:[#allocation25_spill]] (!%p1152_p1) }
  0x76   : > { %1210 = vmatprep.subr.bf16.mxu0 %v1435_v2  ;;  %1281 = vmatprep.subr.bf16.mxu1 %v1435_v2  ;;  %v1443_v6 = vld [vmem:[%s2004_s12 + $0x20] sm:$0xff]   ;;  %v1444_v11 = vld [vmem:[%s2004_s12 + $0x8] sm:$0xff]   ;;  %v1447_v14 = vld [vmem:[%s2004_s12 + $0x30] sm:$0xff]  }
  0x77   : > { %1224 = vmatprep.mubr.bf16.mxu0 %v1442_v5  ;;  %1232 = vmatprep.mubr.bf16.mxu1 %v1443_v6  ;;  %v1441_v10 = vld [vmem:[#allocation6] sm:$0xff]   ;;  %v1445_v12 = vld [vmem:[%s2004_s12 + $0x28] sm:$0xff]   ;;  %v1448_v15 = vld [vmem:[%s2004_s12 + $0x18] sm:$0xff]  }
  0x78   : > { %v1449_v16 = vld [vmem:[%s2004_s12 + $0x38] sm:$0xff]  }
  0x79   : > { %1211 = vmatpush3.bf16.msra.mxu0 %v1435_v2  ;;  %1289 = vmatpush3.bf16.msra.mxu1 %v1435_v2  ;;  %v2036_v17 = vld [vmem:[%s2186_s2] ss:$0 sm:$0xff] }
  0x7a   : > { %1212 = vmatprep.subr.bf16.mxu0 %v1436_v3  ;;  %1282 = vmatprep.subr.bf16.mxu1 %v1436_v3 }
  0x7d   : > { %1213 = vmatpush3.bf16.msra.mxu0 %v1436_v3  ;;  %1290 = vmatpush3.bf16.msra.mxu1 %v1436_v3 }
  0x7e   : > { %1214 = vmatprep.subr.bf16.mxu0 %v1437_v4  ;;  %1283 = vmatprep.subr.bf16.mxu1 %v1437_v4 }
  0x81   : > { %1215 = vmatpush3.bf16.msra.mxu0 %v1437_v4  ;;  %1291 = vmatpush3.bf16.msra.mxu1 %v1437_v4 }
  0x82   : > { %1216 = vmatprep.subr.bf16.mxu0 %v1438_v7  ;;  %1284 = vmatprep.subr.bf16.mxu1 %v1438_v7 }
  0x85   : > { %1217 = vmatpush3.bf16.msra.mxu0 %v1438_v7  ;;  %1292 = vmatpush3.bf16.msra.mxu1 %v1438_v7 }
  0x86   : > { %1218 = vmatprep.subr.bf16.mxu0 %v1439_v8  ;;  %1285 = vmatprep.subr.bf16.mxu1 %v1439_v8 }
  0x89   : > { %1219 = vmatpush3.bf16.msra.mxu0 %v1439_v8  ;;  %1293 = vmatpush3.bf16.msra.mxu1 %v1439_v8 }
  0x8a   : > { %1220 = vmatprep.subr.bf16.mxu0 %v1440_v9  ;;  %1286 = vmatprep.subr.bf16.mxu1 %v1440_v9 }
  0x8d   : > { %1221 = vmatpush3.bf16.msra.mxu0 %v1440_v9  ;;  %1294 = vmatpush3.bf16.msra.mxu1 %v1440_v9 }
  0x8e   : > { %1222 = vmatprep.subr.bf16.mxu0 %v1441_v10  ;;  %1287 = vmatprep.subr.bf16.mxu1 %v1441_v10 }
  0x91   : > { %1223 = vmatpush3.bf16.msra.mxu0 %v1441_v10  ;;  %1295 = vmatpush3.bf16.msra.mxu1 %v1441_v10 }
  0x94   : > { %1225 = vmatmul.mubr.bf16.vlgmr.msra.gmra.mxu0 %v1444_v11  ;;  %1233 = vmatmul.mubr.bf16.vlgmr.msra.gmra.mxu1 %v1445_v12 }
  0x95   : > { %1228 = vmatprep.mubr.bf16.mxu0 %v1446_v13  ;;  %1236 = vmatprep.mubr.bf16.mxu1 %v1447_v14 }
  0x9c   : > { %1229 = vmatmul.mubr.bf16.gmra.mxu0 %v1448_v15  ;;  %1237 = vmatmul.mubr.bf16.gmra.mxu1 %v1449_v16 }
 0x154   : > { %v1226_v18 = vpop.f32.mrf.mxu0  ;;  %v1234_v19 = vpop.f32.mrf.mxu1 }
 0x155   : > { %v2039_v20 = vadd.f32 %v1226_v18, %v2036_v17  ;;  %v2072_v47 = vadd.f32 %v1234_v19, %v2036_v17 }
 0x156   : > { %v533_v21 = vpop.f32.mrf.mxu0  ;;  %v565_v22 = vpop.f32.mrf.mxu1 }
 0x157   : > { %v1138_v23 = vmul.f32 -1.442695, %v2039_v20  ;;  %v2043_v24 = vadd.f32 %v2036_v17, %v533_v21  ;;  %v2058_v37 = vadd.f32 %v2036_v17, %v565_v22  ;;  %v1146_v57 = vmul.f32 -1.442695, %v2072_v47 }
 0x158   : > { %v1227_v25 = vpop.f32.mrf.mxu0  ;;  %v1235_v26 = vpop.f32.mrf.mxu1 }
 0x159   : > { %v1136_v27 = vmul.f32 -1.442695, %v2043_v24  ;;  %v2047_v28 = vadd.f32 %v1227_v25, %v2036_v17  ;;  %1450 = vpow2.f32 %v1138_v23  ;;  %v1144_v48 = vmul.f32 -1.442695, %v2058_v37 }
 0x15a   : > { %v536_v29 = vpop.f32.mrf.mxu0  ;;  %v568_v30 = vpop.f32.mrf.mxu1  ;;  %v2076_v50 = vadd.f32 %v1235_v26, %v2036_v17 }
 0x15b   : > { %1452 = vpow2.f32 %v1136_v27  ;;  %v1139_v31 = vmul.f32 -1.442695, %v2047_v28  ;;  %v2051_v32 = vadd.f32 %v2036_v17, %v536_v29  ;;  %v2065_v43 = vadd.f32 %v2036_v17, %v568_v30 }
 0x15c   : > { %v1230_v33 = vpop.f32.mrf.mxu0  ;;  %v1238_v34 = vpop.f32.mrf.mxu1  ;;  %v1147_v59 = vmul.f32 -1.442695, %v2076_v50 }
 0x15d   : > { %1454 = vpow2.f32 %v1139_v31  ;;  %v1137_v35 = vmul.f32 -1.442695, %v2051_v32  ;;  %v2055_v36 = vadd.f32 %v1230_v33, %v2036_v17  ;;  %v1145_v54 = vmul.f32 -1.442695, %v2065_v43 }
 0x15e   : > { %v549_v38 = vpop.f32.mrf.mxu0  ;;  %v581_v39 = vpop.f32.mrf.mxu1  ;;  %v2094_v2 = vadd.f32 %v1238_v34, %v2036_v17 }
 0x15f   : > { %1456 = vpow2.f32 %v1137_v35  ;;  %v1142_v40 = vmul.f32 -1.442695, %v2055_v36  ;;  %v2062_v41 = vadd.f32 %v2036_v17, %v549_v38  ;;  %v2083_v53 = vadd.f32 %v2036_v17, %v581_v39 }
 0x160   : > { %v1231_v42 = vpop.f32.mrf.mxu0  ;;  %v1239_v46 = vpop.f32.mrf.mxu1  ;;  %v1150_v8 = vmul.f32 -1.442695, %v2094_v2 }
 0x161   : > { %v1140_v44 = vmul.f32 -1.442695, %v2062_v41  ;;  %v2069_v45 = vadd.f32 %v1231_v42, %v2036_v17  ;;  %1458 = vpow2.f32 %v1142_v40  ;;  %v1148_v61 = vmul.f32 -1.442695, %v2083_v53 }
 0x162   : > { %v552_v49 = vpop.f32.mrf.mxu0  ;;  %v584_v56 = vpop.f32.mrf.mxu1  ;;  %v2098_v7 = vadd.f32 %v1239_v46, %v2036_v17 }
 0x163   : > { %1460 = vpow2.f32 %v1140_v44  ;;  %v1143_v51 = vmul.f32 -1.442695, %v2069_v45  ;;  %v2080_v52 = vadd.f32 %v2036_v17, %v552_v49  ;;  %v2091_v62 = vadd.f32 %v2036_v17, %v584_v56 }
 0x164   : > { %v1151_v12 = vmul.f32 -1.442695, %v2098_v7 }
 0x165   : > { %1462 = vpow2.f32 %v1143_v51  ;;  %v1141_v55 = vmul.f32 -1.442695, %v2080_v52  ;;  %v1149_v4 = vmul.f32 -1.442695, %v2091_v62 }
 0x166   : > { %1464 = vpow2.f32 %v1144_v48  ;;  %v1451_v58 = vpop.eup %1450 }
 0x167   : > { %1466 = vpow2.f32 %v1141_v55  ;;  %v646_v1 = vadd.f32 1.0, %v1451_v58 }
 0x168   : > { %v1453_v60 = vpop.eup %1452  ;;  %1468 = vpow2.f32 %v1145_v54 }
 0x169   : > { %v644_v63 = vadd.f32 1.0, %v1453_v60  ;;  %1470 = vpow2.f32 %v1146_v57 }
 0x16a   : > { %v1455_v0 = vpop.eup %1454  ;;  %1472 = vpow2.f32 %v1147_v59 }
 0x16b   : > { %1474 = vpow2.f32 %v1148_v61  ;;  %v647_v5 = vadd.f32 1.0, %v1455_v0 }
 0x16c   : > { %v1457_v3 = vpop.eup %1456  ;;  %1476 = vrcp.f32 %v644_v63 }
 0x16d   : > { %v645_v6 = vadd.f32 1.0, %v1457_v3  ;;  %1478 = vrcp.f32 %v646_v1 }
 0x16e   : > { %v1459_v9 = vpop.eup %1458 }
 0x16f   : > { %1480 = vrcp.f32 %v645_v6  ;;  %v650_v14 = vadd.f32 1.0, %v1459_v9 }
 0x170   : > { %v1461_v10 = vpop.eup %1460  ;;  %1482 = vpow2.f32 %v1149_v4 }
 0x171   : > { %1484 = vrcp.f32 %v647_v5  ;;  %v648_v11 = vadd.f32 1.0, %v1461_v10 }
 0x172   : > { %v1463_v13 = vpop.eup %1462  ;;  %1486 = vpow2.f32 %v1150_v8 }
 0x173   : > { %v1465_v15 = vpop.eup %1464  ;;  %1488 = vrcp.f32 %v648_v11  ;;  %v651_v18 = vadd.f32 1.0, %v1463_v13 }
 0x174   : > { %v1467_v16 = vpop.eup %1466  ;;  %1490 = vpow2.f32 %v1151_v12  ;;  %v652_v22 = vadd.f32 1.0, %v1465_v15 }
 0x175   : > { %v649_v17 = vadd.f32 1.0, %v1467_v16  ;;  %v1469_v19 = vpop.eup %1468  ;;  %1492 = vrcp.f32 %v650_v14 }
 0x176   : > { %v1471_v21 = vpop.eup %1470  ;;  %v653_v26 = vadd.f32 1.0, %v1469_v19 }
 0x177   : > { %1494 = vrcp.f32 %v649_v17  ;;  %v1473_v23 = vpop.eup %1472  ;;  %v654_v30 = vadd.f32 1.0, %v1471_v21 }
 0x178   : > { %v1475_v25 = vpop.eup %1474  ;;  %1496 = vrcp.f32 %v651_v18  ;;  %v655_v35 = vadd.f32 1.0, %v1473_v23 }
 0x179   : > { %v1477_v27 = vpop.eup %1476  ;;  %1498 = vrcp.f32 %v652_v22  ;;  %v656_v46 = vadd.f32 1.0, %v1475_v25 }
 0x17a   : > { %v1479_v29 = vpop.eup %1478  ;;  %v692_v34 = vmul.f32 %v1477_v27, %v2043_v24  ;;  %1500 = vrcp.f32 %v653_v26 }
 0x17b   : > { %v694_v42 = vmul.f32 %v1479_v29, %v2039_v20  ;;  %1502 = vrcp.f32 %v654_v30  ;;  %v708_v29 = vld [vmem:[#allocation2] sm:$0x1] }
 0x17c   : > { %v1481_v31 = vpop.eup %1480  ;;  %1504 = vrcp.f32 %v655_v35 }
 0x17d   : > { %v1483_v33 = vpop.eup %1482  ;;  %v693_v38 = vmul.f32 %v1481_v31, %v2051_v32  ;;  %1506 = vrcp.f32 %v656_v46 }
 0x17e   : > { %v1485_v39 = vpop.eup %1484  ;;  %v657_v54 = vadd.f32 1.0, %v1483_v33 }
 0x17f   : > { %v1487_v40 = vpop.eup %1486  ;;  %v709_v44 = vadd.f32 %v693_v38, %v692_v34  ;;  %v695_v49 = vmul.f32 %v1485_v39, %v2047_v28 }
 0x180   : > { %v1489_v48 = vpop.eup %1488  ;;  %v658_v24 = vadd.f32 1.0, %v1487_v40  ;;  %1508 = vrcp.f32 %v657_v54 }
 0x181   : > { %v710_v51 = vadd.f32 %v709_v44, %v694_v42  ;;  %v1491_v55 = vpop.eup %1490  ;;  %v696_v57 = vmul.f32 %v1489_v48, %v2062_v41 }
 0x182   : > { %v1493_v56 = vpop.eup %1492  ;;  %v659_v60 = vadd.f32 1.0, %v1491_v55  ;;  %1510 = vrcp.f32 %v658_v24 }
 0x183   : > { %v711_v32 = vadd.f32 %v710_v51, %v695_v49  ;;  %v698_v63 = vmul.f32 %v1493_v56, %v2055_v36 }
 0x184   : > { %v1495_v58 = vpop.eup %1494  ;;  %1512 = vrcp.f32 %v659_v60 }
 0x185   : > { %v712_v59 = vadd.f32 %v711_v32, %v696_v57  ;;  %v697_v20 = vmul.f32 %v1495_v58, %v2080_v52  ;;  %v1497_v61 = vpop.eup %1496 }
 0x186   : > { %v1499_v0 = vpop.eup %1498  ;;  %v699_v1 = vmul.f32 %v1497_v61, %v2069_v45 }
 0x187   : > { %v713_v28 = vadd.f32 %v712_v59, %v697_v20  ;;  %v1501_v4 = vpop.eup %1500  ;;  %v700_v41 = vmul.f32 %v1499_v0, %v2058_v37 }
 0x188   : > { %v1503_v6 = vpop.eup %1502  ;;  %v701_v8 = vmul.f32 %v1501_v4, %v2065_v43 }
 0x189   : > { %v714_v3 = vadd.f32 %v713_v28, %v698_v63  ;;  %v1505_v52 = vpop.eup %1504  ;;  %v702_v10 = vmul.f32 %v1503_v6, %v2072_v47 }
 0x18a   : > { %v1507_v36 = vpop.eup %1506  ;;  %v703_v12 = vmul.f32 %v1505_v52, %v2076_v50 }
 0x18b   : > { %v715_v5 = vadd.f32 %v714_v3, %v699_v1  ;;  %v704_v45 = vmul.f32 %v1507_v36, %v2083_v53 }
 0x18d   : > { %v716_v9 = vadd.f32 %v715_v5, %v700_v41  ;;  %v1509_v14 = vpop.eup %1508 }
 0x18e   : > { %v705_v37 = vmul.f32 %v1509_v14, %v2091_v62 }
 0x18f   : > { %v717_v11 = vadd.f32 %v716_v9, %v701_v8  ;;  %v1511_v16 = vpop.eup %1510 }
 0x190   : > { %v706_v43 = vmul.f32 %v1511_v16, %v2094_v2 }
 0x191   : > { %v718_v13 = vadd.f32 %v717_v11, %v702_v10  ;;  %v1513_v17 = vpop.eup %1512 }
 0x192   : > { %v707_v21 = vmul.f32 %v1513_v17, %v2098_v7 }
 0x193   : > { %v719_v15 = vadd.f32 %v718_v13, %v703_v12 }
 0x195   : > { %v720_v18 = vadd.f32 %v719_v15, %v704_v45 }
 0x197   : > { %v721_v19 = vadd.f32 %v720_v18, %v705_v37 }
 0x199   : > { %v722_v47 = vadd.f32 %v721_v19, %v706_v43 }
 0x19b   : > { %v723_v22 = vadd.f32 %v722_v47, %v707_v21 }
 0x19d   : > { %v724_v23 = vrot.slane %v723_v22, 4 }
 0x19f   : > { %v725_v25 = vadd.f32 %v724_v23, %v723_v22 }
 0x1a1   : > { %v726_v50 = vrot.slane %v725_v25, 2 }
 0x1a3   : > { %v727_v26 = vadd.f32 %v726_v50, %v725_v25 }
 0x1a5   : > { %v728_v27 = vrot.slane %v727_v26, 1 }
 0x1a7   : > { %v729_v53 = vadd.f32 %v728_v27, %v727_v26  ;;  %735 = sbr.rel (%p1152_p1) target bundleno = 1202 (0x4b2), region = 72 }
 0x1a9   : > { %v730_v30 = vadd.f32 %v729_v53, %v708_v29 }
 0x1ab   : > { %731 = vst [vmem:[#allocation2] sm:$0x1] %v730_v30 }
 0x1ac   : > { %v1514_v62 = vld [vmem:[#allocation8 + $0x38] sm:$0xff]   ;;  %v1781_v31 = vmov 0.0   ;;  %v1515_v2 = vld [vmem:[#allocation8 + $0x30] sm:$0xff]   ;;  %vm1782_vm0 = vmmov 0   ;;  %v1516_v7 = vld [vmem:[#allocation8 + $0x28] sm:$0xff]   ;;  %vm957_vm1 = vcmask 1040384   ;;  %v969_v45 = vlaneseq }
 0x1ad   : > { %1240 = vmatprep.subr.bf16.mxu0 %v1781_v31  ;;  %1260 = vmatprep.subr.bf16.mxu1 %v1781_v31  ;;  %v1517_v33 = vld [vmem:[#allocation8 + $0x20] sm:$0xff]   ;;  %v1518_v34 = vld [vmem:[#allocation8 + $0x18] sm:$0xff]   ;;  %v1519_v35 = vld [vmem:[#allocation8 + $0x10] sm:$0xff]  }
 0x1ae   : > { %1241 = vmatpush3.bf16.msra.mxu0 %v1514_v62  ;;  %1256 = vmatprep.mubr.msk.bf16.mxu0 %vm1782_vm0, %v1781_v31  ;;  %v1520_v38 = vld [vmem:[#allocation8 + $0x8] sm:$0xff]   ;;  %v1521_v42 = vld [vmem:[#allocation8] sm:$0xff]   ;;  %v1522_v46 = vld [vmem:[#allocation9 + $0x38] sm:$0xff]   ;;  %v970_v15 = vshrl.u32 %v969_v45, 7 }
 0x1af   : > { %1242 = vmatprep.subr.bf16.mxu0 %v1781_v31  ;;  %1276 = vmatprep.mubr.msk.bf16.mxu1 %vm1782_vm0, %v1781_v31  ;;  %v1523_v48 = vld [vmem:[#allocation9 + $0x30] sm:$0xff]   ;;  %v1524_v49 = vld [vmem:[#allocation9 + $0x28] sm:$0xff]   ;;  %v1525_v51 = vld [vmem:[#allocation9 + $0x20] sm:$0xff]  }
 0x1b0   : > { %1261 = vmatpush3.bf16.msra.mxu1 %v1522_v46  ;;  %v1526_v54 = vld [vmem:[#allocation9 + $0x18] sm:$0xff]   ;;  %v1527_v55 = vld [vmem:[#allocation9 + $0x10] sm:$0xff]   ;;  %v1528_v56 = vld [vmem:[#allocation9 + $0x8] sm:$0xff]   ;;  %v971_v16 = vsub.s32 0, %v970_v15 }
 0x1b1   : > { %1262 = vmatprep.subr.bf16.mxu1 %v1781_v31  ;;  %v1529_v24 = vld [vmem:[#allocation9] sm:$0xff]   ;;  %v755_v57 = vld [vmem:[%s2225_s23] sm:$0x1] }
 0x1b2   : > { %1243 = vmatpush3.bf16.msra.mxu0 %v1515_v2  ;;  %v736_v39 = vld [vmem:[#allocation2] sm:$0x1] }
 0x1b3   : > { %1244 = vmatprep.subr.bf16.mxu0 %v1781_v31  ;;  %v737_v40 = vmul.f32 0.00390625, %v736_v39  ;;  %v868_v4 = vld [vmem:[%s2226_s5] sm:$0x1] }
 0x1b4   : > { %1263 = vmatpush3.bf16.msra.mxu1 %v1523_v48 }
 0x1b5   : > { %v738_v44 = vpack.c.bf16 %v737_v40, %v737_v40  ;;  %1264 = vmatprep.subr.bf16.mxu1 %v1781_v31 }
 0x1b6   : > { %1245 = vmatpush3.bf16.msra.mxu0 %v1516_v7 }
 0x1b7   : > { %1246 = vmatprep.subr.bf16.mxu0 %v1781_v31 }
 0x1b8   : > { %1265 = vmatpush3.bf16.msra.mxu1 %v1524_v49 }
 0x1b9   : > { %1266 = vmatprep.subr.bf16.mxu1 %v1781_v31 }
 0x1ba   : > { %1247 = vmatpush3.bf16.msra.mxu0 %v1517_v33 }
 0x1bb   : > { %1248 = vmatprep.subr.bf16.mxu0 %v1781_v31 }
 0x1bc   : > { %1267 = vmatpush3.bf16.msra.mxu1 %v1525_v51 }
 0x1bd   : > { %1268 = vmatprep.subr.bf16.mxu1 %v1781_v31 }
 0x1be   : > { %1249 = vmatpush3.bf16.msra.mxu0 %v1518_v34 }
 0x1bf   : > { %1250 = vmatprep.subr.bf16.mxu0 %v1781_v31 }
 0x1c0   : > { %1269 = vmatpush3.bf16.msra.mxu1 %v1526_v54 }
 0x1c1   : > { %1270 = vmatprep.subr.bf16.mxu1 %v1781_v31 }
 0x1c2   : > { %1251 = vmatpush3.bf16.msra.mxu0 %v1519_v35 }
 0x1c3   : > { %1252 = vmatprep.subr.bf16.mxu0 %v1781_v31 }
 0x1c4   : > { %1271 = vmatpush3.bf16.msra.mxu1 %v1527_v55 }
 0x1c5   : > { %1272 = vmatprep.subr.bf16.mxu1 %v1781_v31 }
 0x1c6   : > { %1253 = vmatpush3.bf16.msra.mxu0 %v1520_v38 }
 0x1c7   : > { %1254 = vmatprep.subr.bf16.mxu0 %v1781_v31 }
 0x1c8   : > { %1273 = vmatpush3.bf16.msra.mxu1 %v1528_v56 }
 0x1c9   : > { %1274 = vmatprep.subr.bf16.mxu1 %v1781_v31 }
 0x1ca   : > { %1255 = vmatpush3.bf16.msra.mxu0 %v1521_v42 }
 0x1cc   : > { %1275 = vmatpush3.bf16.msra.mxu1 %v1529_v24 }
 0x1cd   : > { %1257 = vmatmul.mubr.bf16.vlgmr.msra.gmra.mxu0 %v738_v44 }
 0x28d   : > { %v838_v32 = vpop.f32.mrf.mxu0 }
 0x28e   : > { %v839_v58 = vadd.f32 %v838_v32, %v755_v57 }
 0x28f   : > { %v1258_v59 = vpop.f32.mrf.mxu0 }
 0x290   : > { %v1161_v60 = vmul.f32 -1.442695, %v839_v58 }
 0x291   : > { %v841_v20 = vpop.f32.mrf.mxu0 }
 0x292   : > { %1530 = vpow2.f32 %v1161_v60 }
 0x293   : > { %v1259_v61 = vpop.f32.mrf.mxu0 }
 0x29f   : > { %v1531_v63 = vpop.eup %1530 }
 0x2a0   : > { %v847_v28 = vadd.f32 1.0, %v1531_v63 }
 0x2a2   : > { %1532 = vrcp.f32 %v847_v28 }
 0x2af   : > { %v1533_v0 = vpop.eup %1532 }
 0x2b0   : > { %v850_v1 = vmul.f32 %v1533_v0, %v839_v58 }
 0x2b2   : > { %v851_v3 = vpack.c.bf16 %v850_v1, %v850_v1 }
 0x2b4   : > { %1277 = vmatmul.mubr.bf16.vlgmr.msra.gmra.mxu1 %v851_v3 }
 0x374   : > { %v951_v41 = vpop.f32.mrf.mxu1 }
 0x375   : > { %v952_v5 = vadd.f32 %v951_v41, %v868_v4 }
 0x376   : > { %v1278_v6 = vpop.f32.mrf.mxu1 }
 0x377   : > { %v958_v8 = vsel %vm957_vm1, %v952_v5, -inf }
 0x378   : > { %959 = vmax.xlane.f32.xlu0 %v958_v8  ;;  %v954_v9 = vpop.f32.mrf.mxu1 }
 0x37a   : > { %v1279_v52 = vpop.f32.mrf.mxu1 }
 0x401   : > { %v960_v10 = vpop.xlane.xlu0 %959 }
 0x402   : > { %v961_v11 = vsub.f32 %v952_v5, %v960_v10 }
 0x404   : > { %v962_v36 = vmul.f32 1.442695, %v961_v11 }
 0x406   : > { %1534 = vpow2.f32 %v962_v36 }
 0x413   : > { %v1535_v12 = vpop.eup %1534 }
 0x414   : > { %v964_v13 = vsel %vm957_vm1, %v1535_v12, 0.0 }
 0x415   : > { %965 = vadd.xlane.f32.xlu0 %v964_v13 }
 0x49e   : > { %v966_v14 = vpop.xlane.xlu0 %965 }
 0x49f   : > { %1536 = vrcp.f32 %v966_v14 }
 0x4ac   : > { %v1537_v37 = vpop.eup %1536 }
 0x4ad   : > { %v968_v18 = vmul.f32 %v1537_v37, %v1535_v12 }
 0x4af   : > { %v972_v17 = vrot.slane %v968_v18, %v971_v16 }
 0x4b1   : > { %973 = vst [vmem:[%s356_s16] sm:$0xff] %v972_v17 }
 0x4b2 PF: > { %s2227_s8 = sld [smem:[#allocation17_spill]]  ;;  %s988_s12 = sshll.u32 %s356_s16, 4  ;;  %s989_s12 = int_to_ptr.vmem [resolvable:$true] %s988_s12 }
 0x4b3   : > { %s2229_s15 = sld [smem:[#allocation26_spill]]  ;;  %s975_s14 = scalar_lea.sflag [#allocation5], %s354_s4 }
 0x4b4   : > { %s1644_s19 = scalar_lea.vmem %s989_s12, 128  ;;  %s1783_s30 = smov [#allocation11]  }
 0x4b5   : > { %p1645_p11 = scmp.ne.s32.totalorder %s989_s12, %s1644_s19  ;;  %s1648_s7 = sshll.u32 %s1783_s30, 4  ;;  %s1649_s7 = int_to_ptr.vmem [resolvable:$false] %s1648_s7 }
 0x4b6   : > { %s1650_s23 = scalar_lea.vmem %s1649_s7, 256  ;;  %p1651_p10 = scmp.lt.s32.totalorder %s989_s12, %s1649_s7 }
 0x4b7   : > { %p1646_p6 = pnand %p1645_p11, %p1895_p7  ;;  %p1652_p9 = scmp.lt.s32.totalorder %s1650_s23, %s1644_s19 }
 0x4b8   : > { %s1171_s21 = sshll.u32 %s2227_s8, 7 }
 0x4b9   : > { %s986_s18 = scalar_lea.hbm %s2229_s15, %s1171_s21  ;;  %p1647_p8 = pneg %p1646_p6 }
 0x4ba   : > { %p1653_p0 = por %p1652_p9, %p1651_p10 }
 0x4bc   : > { %p1654_p12 = pnand %p1653_p0, %p1647_p8 }
 0x4be   : > { %1657 = shalt.err (!%p1654_p12)
}
 0x4bf   : > { %s1658_s24 = scalar_lea.hbm %s986_s18, 128  ;;  %s1662_s16 = scalar_lea.hbm %s2229_s15, 256 }
 0x4c0   : > { %p1659_p2 = scmp.ne.s32.totalorder %s986_s18, %s1658_s24  ;;  %p1663_p5 = scmp.lt.s32.totalorder %s986_s18, %s2229_s15 }
 0x4c1   : > { %p1664_p3 = scmp.lt.s32.totalorder %s1662_s16, %s1658_s24 }
 0x4c2   : > { %p1660_p4 = pnand %p1659_p2, %p1895_p7 }
 0x4c3   : > { %p1665_p1 = por %p1664_p3, %p1663_p5 }
 0x4c4   : > { %p1661_p13 = pneg %p1660_p4 }
 0x4c6   : > { %p1666_p11 = pnand %p1665_p1, %p1661_p13 }
 0x4c8   : > { %1669 = shalt.err (!%p1666_p11)
}
 0x4c9   : > { %1310 = dma.vmem_to_hbm [thread:$0]  (%p1895_p7), %s989_s12, 128, %s986_s18, %s975_s14  }
 0x4ca PF: > { %s2230_s8 = sld [smem:[#allocation16_spill]]  ;;  %p1337_p6 = scmp.ge.s32.totalorder %s1772_s11, 2 }
 0x4cb   : > { %s2231_s21 = sld [smem:[#allocation19_spill]] }
 0x4d0   : > { %s1000_s6 = sand.u32 1, %s2230_s8  }
 0x4d1   : > { %p2232_p8 = scmp.ne.s32.totalorder %s2231_s21, 0  ;;  %s1001_s13 = scalar_lea.sflag [#allocation5], %s1000_s6 }
 0x4d3   : > { %p1327_p10 = pnand %p1337_p6, %p2232_p8 }
 0x4d5   : > { %p1328_p9 = pneg %p1327_p10 }
 0x4d7   : > { %1727 = dma.done.wait (%p1328_p9), %s1001_s13, 128  }
 0x4d8   : > { %1729 = vsyncadd (%p1328_p9), %s1001_s13, 4294967168  ;;  %s25_s11 = sadd.s32 1, %s1772_s11   ;;  %s2233_s20 = sld [smem:[#allocation20_spill]] }
 0x4d9   : > { %p22_p0 = scmp.ge.s32.totalorder %s25_s11, 6   ;;  %s2234_s24 = smov %s1736_s25 }
 0x4da   : > { %s2235_s25 = smov %s1740_s26  ;;  %s2236_s26 = smov %s1977_s1 }
 0x4db   : > { %s2237_s27 = smov %s1748_s28  ;;  %s2238_s28 = smov %s1752_s29 }
 0x4dc   : > { %s2239_s29 = smov %s1980_s3  ;;  %s2240_s30 = smov %s1764_s9 }
 0x4dd   : > { %s2241_s8 = smov %s1768_s10  ;;  %s2243_s10 = smov %s2249_s22 }
 0x4de   : > { %s2242_s9 = smov %s2233_s20  ;;  %24 = sbr.rel (!%p22_p0) target bundleno = 18 (0x12), region = 113 }
 0x4e3   :  { %1006 = vsyncpa [#allocation4], 1 }
 0x4e4   :  { %1008 = vsyncpa [#allocation4 + $0x1], 1 }
 0x4e5   :  { %1009 = vsyncpa [#allocation7], 1 }
 0x4e6   :  { %1010 = vsyncpa [#allocation10], 1 }
 0x4e7   :  { %1011 = vsyncpa [#allocation5], 1 }
 0x4e8   :  { %1013 = vsyncpa [#allocation5 + $0x1], 1 }

</bundles_post_ra>
